<compile_context>
chip_gen: v6e
topology: v6e:2x2x1
jax: 0.10.0
libtpu: 0.0.40
codegen_flags: <defaults>
</compile_context>

<pallas_src>
import jax
import jax.numpy as jnp
from jax.experimental import pallas as pl
from jax.experimental.pallas import tpu as pltpu


def _round_up(n, m):
    return ((n + m - 1) // m) * m


def _vmem_capacity_bytes():
    """Per-generation VMEM capacity, with a conservative fallback."""
    try:
        info = pltpu.get_tpu_info()
        cap = getattr(info, "vmem_capacity_bytes", None)
        if cap:
            return int(cap)
    except Exception:
        pass
    return 64 << 20  # v7x per-TensorCore VMEM (smallest of v5e/v6e/v7x)


def _linear_kernel(x_ref, wt_ref, b_ref, o_ref, acc_ref):
    """One (batch-tile, k-tile) grid step of y = x @ W.T + b.

    x_ref  : (tb, tk)  activation tile (streams)
    wt_ref : (tk, C)   pre-transposed weight tile -> canonical (K, N) for MXU
    b_ref  : (1, C)    bias (grid-resident, constant index map)
    o_ref  : (tb, C)   output tile (written once, at the last k step)
    acc_ref: (tb, C)   f32 accumulator scratch (persists across the k axis)
    """
    k = pl.program_id(1)

    @pl.when(k == 0)
    def _init():
        acc_ref[...] = jnp.zeros_like(acc_ref)

    acc_ref[...] += jnp.dot(x_ref[...], wt_ref[...],
                            preferred_element_type=jnp.float32)

    @pl.when(k == pl.num_programs(1) - 1)
    def _finalize():
        o_ref[...] = (acc_ref[...] + b_ref[...]).astype(o_ref.dtype)


def feat_classifier_simpl_forward(x, weight, bias, *, tile_b=None, tile_k=None):
    """Plain Linear forward: x (B, D), weight (C, D), bias (C,) -> (B, C)."""
    B, D = x.shape
    C, D_w = weight.shape
    assert D_w == D and bias.shape == (C,)
    out_dtype = x.dtype
    itemsize = jnp.dtype(x.dtype).itemsize

    # ---- VMEM budget (per chip generation) ---------------------------------
    vmem_cap = _vmem_capacity_bytes()
    budget = vmem_cap // 2  # headroom for compiler scratch / pipeline state

    # ---- K (feat_dim) tile --------------------------------------------------
    max_tk = 4096
    if tile_k is None:
        if D <= max_tk:
            tk = D
        else:
            tk = max_tk
            # Prefer a multiple of 128 that divides D so no D padding is needed.
            for cand in range(max_tk, 127, -128):
                if D % cand == 0:
                    tk = cand
                    break
    else:
        tk = min(int(tile_k), D)
        if tk < D:
            tk = max(128, (tk // 128) * 128)
    if tk >= D:
        tk, D_pad = D, D
    else:
        D_pad = _round_up(D, tk)
    nk = D_pad // tk

    # ---- batch tile from VMEM budget ---------------------------------------
    if tile_b is None:
        # Bigger tiles for small feat_dim: amortizes ~0.35 us per-grid-step cost.
        tile_b = 2048 if tk <= 1024 else (1024 if tk <= 4096 else 512)
    # Per-grid-step VMEM estimate:
    #   x: 2*tb*tk*it (dbl-buf) + out: 2*tb*C*it (dbl-buf) + acc: tb*C*4
    #   w: 2*tk*C*it + bias: 2*C*4   (constant index map; budget 2 bufs anyway)
    fixed = 2 * tk * C * itemsize + 2 * C * 4
    per_row = 2 * tk * itemsize + 2 * C * itemsize + C * 4
    tb_cap = max(8, ((budget - fixed) // max(per_row, 1)) // 8 * 8)
    tb = max(8, (min(int(tile_b), tb_cap) // 8) * 8)
    tb = min(tb, _round_up(B, 8))  # never tile beyond the (8-rounded) batch

    # ---- prepare operands (cheap, one-time) ---------------------------------
    x_p = x
    w_t = weight.T  # (D, C): one-time transpose outside the kernel
    if D_pad != D:  # zero-padded K columns are inert in the contraction
        x_p = jnp.pad(x_p, ((0, 0), (0, D_pad - D)))
        w_t = jnp.pad(w_t, ((0, D_pad - D), (0, 0)))
    if B % 8 != 0:  # at most 7 extra rows; common aligned case pays nothing
        x_p = jnp.pad(x_p, ((0, _round_up(B, 8) - B), (0, 0)))
    B_p = x_p.shape[0]
    b2 = bias.reshape(1, C)

    nb = pl.cdiv(B_p, tb)  # trailing partial batch block is masked by Pallas

    est = fixed + tb * per_row + (2 << 20)
    vmem_limit = int(min(vmem_cap, max(est, 32 << 20)))

    out = pl.pallas_call(
        _linear_kernel,
        out_shape=jax.ShapeDtypeStruct((B_p, C), out_dtype),
        grid_spec=pltpu.PrefetchScalarGridSpec(
            num_scalar_prefetch=0,
            grid=(nb, nk),
            in_specs=[
                pl.BlockSpec((tb, tk), lambda i, k: (i, k)),   # x streams
                pl.BlockSpec((tk, C), lambda i, k: (k, 0)),    # W.T tile
                pl.BlockSpec((1, C), lambda i, k: (0, 0)),     # bias resident
            ],
            out_specs=pl.BlockSpec((tb, C), lambda i, k: (i, 0)),
            scratch_shapes=[pltpu.VMEM((tb, C), jnp.float32)],
        ),
        compiler_params=pltpu.CompilerParams(
            dimension_semantics=("parallel", "arbitrary"),
            vmem_limit_bytes=vmem_limit,
        ),
    )(x_p, w_t, b2)

    return out[:B, :] if B_p != B else out


if __name__ == "__main__":
    # Small shapes consistent with the module: feat_dim=256, class_num=16.
    B, D, C = 8, 256, 16
    key = jax.random.PRNGKey(0)
    kx, kw, kb, kx2 = jax.random.split(key, 4)

    # xavier_normal_ weight init: std = sqrt(2 / (fan_in + fan_out)).
    std = (2.0 / (D + C)) ** 0.5
    w = jax.random.normal(kw, (C, D), dtype=jnp.float32) * std
    # nn.Linear default bias init: U(-1/sqrt(fan_in), 1/sqrt(fan_in)).
    bound = 1.0 / (D ** 0.5)
    b = jax.random.uniform(kb, (C,), minval=-bound, maxval=bound,
                           dtype=jnp.float32)
    x = jax.random.normal(kx, (B, D), dtype=jnp.float32)

    out = feat_classifier_simpl_forward(x, w, b)
    out = jax.block_until_ready(out)
    ref = jnp.dot(x, w.T, precision=jax.lax.Precision.HIGHEST) + b[None, :]
    assert out.shape == (B, C)
    # Loose-ish tolerance: MXU f32 matmuls may go through bf16 passes.
    assert jnp.allclose(out, ref, atol=1e-2, rtol=1e-2), \
        float(jnp.max(jnp.abs(out - ref)))

    # Exercise the K-split accumulator path and a non-divisible batch grid
    # (multiple batch tiles + masked trailing block).
    B2 = 40
    x2 = jax.random.normal(kx2, (B2, D), dtype=jnp.float32)
    out2 = feat_classifier_simpl_forward(x2, w, b, tile_b=16, tile_k=128)
    out2 = jax.block_until_ready(out2)
    ref2 = jnp.dot(x2, w.T, precision=jax.lax.Precision.HIGHEST) + b[None, :]
    assert out2.shape == (B2, C)
    assert jnp.allclose(out2, ref2, atol=1e-2, rtol=1e-2), \
        float(jnp.max(jnp.abs(out2 - ref2)))

    print("KERNEL_OK")
</pallas_src>

<mosaic_0001>
module attributes {stable_mosaic.version = 11 : i64} {
  func.func @_linear_kernel(%arg0: i32, %arg1: i32, %arg2: memref<8x256xf32, #tpu.memory_space<vmem>>, %arg3: memref<256x16xf32, #tpu.memory_space<vmem>>, %arg4: memref<1x16xf32, #tpu.memory_space<vmem>>, %arg5: memref<8x16xf32, #tpu.memory_space<vmem>>, %arg6: memref<8x16xf32, #tpu.memory_space<vmem>>) attributes {dimension_semantics = [#tpu.dimension_semantics<parallel>, #tpu.dimension_semantics<arbitrary>], iteration_bounds = array<i64: 1, 1>, scalar_prefetch = 0 : i64, scratch_operands = 1 : i64, tpu.core_type = #tpu.core_type<tc>, window_params = [{transform_indices = @transform_0, window_bounds = array<i64: 8, 256>}, {transform_indices = @transform_1, window_bounds = array<i64: 256, 16>}, {pipeline_mode = #tpu.pipeline_mode<synchronous>, transform_indices = @transform_2, window_bounds = array<i64: 1, 16>}, {transform_indices = @transform_3, window_bounds = array<i64: 8, 16>}]} {
    %c0_i32 = arith.constant 0 : i32
    %0 = arith.cmpi eq, %arg1, %c0_i32 : i32
    %1 = arith.extui %0 : i1 to i32
    %c0_i32_0 = arith.constant 0 : i32
    %2 = arith.cmpi ne, %1, %c0_i32_0 : i32
    scf.if %2 {
      %cst_10 = arith.constant 0.000000e+00 : f32
      %12 = vector.broadcast %cst_10 : f32 to vector<8x16xf32>
      %c0_11 = arith.constant 0 : index
      %c0_12 = arith.constant 0 : index
      %13 = vector.load %arg6[%c0_11, %c0_12] : memref<8x16xf32, #tpu.memory_space<vmem>>, vector<8x16xf32>
      tpu.vector_store %arg6[%c0_11, %c0_12], %12 {strides = array<i32>} : memref<8x16xf32, #tpu.memory_space<vmem>>, vector<8x16xf32>,
    } else {
    }
    %c0 = arith.constant 0 : index
    %c0_1 = arith.constant 0 : index
    %3 = vector.load %arg6[%c0, %c0_1] : memref<8x16xf32, #tpu.memory_space<vmem>>, vector<8x16xf32>
    %c0_2 = arith.constant 0 : index
    %c0_3 = arith.constant 0 : index
    %4 = vector.load %arg2[%c0_2, %c0_3] : memref<8x256xf32, #tpu.memory_space<vmem>>, vector<8x256xf32>
    %c0_4 = arith.constant 0 : index
    %c0_5 = arith.constant 0 : index
    %5 = vector.load %arg3[%c0_4, %c0_5] : memref<256x16xf32, #tpu.memory_space<vmem>>, vector<256x16xf32>
    %cst = arith.constant dense<0.000000e+00> : vector<8x16xf32>
    %6 = tpu.matmul %4, %5, %cst {dimension_numbers = #tpu.dot_dimension_numbers<[1], [0], [0], [1], [0, 0, 1, 1], [], []>} : vector<8x256xf32>, vector<256x16xf32>, vector<8x16xf32> -> vector<8x16xf32>
    %7 = arith.addf %3, %6 : vector<8x16xf32>
    %c0_6 = arith.constant 0 : index
    %c0_7 = arith.constant 0 : index
    %8 = vector.load %arg6[%c0_6, %c0_7] : memref<8x16xf32, #tpu.memory_space<vmem>>, vector<8x16xf32>
    tpu.vector_store %arg6[%c0_6, %c0_7], %7 {strides = array<i32>} : memref<8x16xf32, #tpu.memory_space<vmem>>, vector<8x16xf32>,
    %c0_i32_8 = arith.constant 0 : i32
    %9 = arith.cmpi eq, %arg1, %c0_i32_8 : i32
    %10 = arith.extui %9 : i1 to i32
    %c0_i32_9 = arith.constant 0 : i32
    %11 = arith.cmpi ne, %10, %c0_i32_9 : i32
    scf.if %11 {
      %c0_10 = arith.constant 0 : index
      %c0_11 = arith.constant 0 : index
      %12 = vector.load %arg6[%c0_10, %c0_11] : memref<8x16xf32, #tpu.memory_space<vmem>>, vector<8x16xf32>
      %c0_12 = arith.constant 0 : index
      %c0_13 = arith.constant 0 : index
      %13 = vector.load %arg4[%c0_12, %c0_13] : memref<1x16xf32, #tpu.memory_space<vmem>>, vector<1x16xf32>
      %14 = vector.broadcast %13 : vector<1x16xf32> to vector<8x16xf32>
      %15 = arith.addf %12, %14 : vector<8x16xf32>
      %c0_14 = arith.constant 0 : index
      %c0_15 = arith.constant 0 : index
      %16 = vector.load %arg5[%c0_14, %c0_15] : memref<8x16xf32, #tpu.memory_space<vmem>>, vector<8x16xf32>
      tpu.vector_store %arg5[%c0_14, %c0_15], %15 {strides = array<i32>} : memref<8x16xf32, #tpu.memory_space<vmem>>, vector<8x16xf32>,
    } else {
    }
    return
  }
  func.func @transform_0(%arg0: i32, %arg1: i32) -> (i32, i32) {
    %c0_i32 = arith.constant 0 : i32
    return %arg0, %arg1 : i32, i32
  }
  func.func @transform_1(%arg0: i32, %arg1: i32) -> (i32, i32) {
    %c0_i32 = arith.constant 0 : i32
    %c0_i32_0 = arith.constant 0 : i32
    return %arg1, %c0_i32 : i32, i32
  }
  func.func @transform_2(%arg0: i32, %arg1: i32) -> (i32, i32) {
    %c0_i32 = arith.constant 0 : i32
    %c0_i32_0 = arith.constant 0 : i32
    %c0_i32_1 = arith.constant 0 : i32
    return %c0_i32, %c0_i32_0 : i32, i32
  }
  func.func @transform_3(%arg0: i32, %arg1: i32) -> (i32, i32) {
    %c0_i32 = arith.constant 0 : i32
    %c0_i32_0 = arith.constant 0 : i32
    return %arg0, %c0_i32 : i32, i32
  }
}

</mosaic_0001>

<bundles_post_ra>
// kernel: tpu_custom_call.1
= control target key start
LH: loop header
LB: loop body
LE: loop exit
PB: predicated region body
PF: predicated region fallthrough
CT: control target
= control target key end

     0   :  { %s346_s0 = inlined_call_operand.vmem [shape: f32[8,256], index: 0, kind: input, shape index: {}]   ;;  %s347_s1 = inlined_call_operand.vmem [shape: f32[256,16], index: 1, kind: input, shape index: {}]   ;;  %s348_s2 = inlined_call_operand.vmem [shape: f32[1,16], index: 2, kind: input, shape index: {}]   ;;  %s349_s3 = inlined_call_operand.hbm [shape: f32[8,16], index: 3, kind: output, shape index: {}]  }
   0x1   :  { %v55_v0 = vld [vmem:[%s347_s1 + $0xf8] sm:$0xff]  ;;  %v54_v2 = vld [vmem:[%s347_s1 + $0xf0] sm:$0xff]  ;;  %v53_v4 = vld [vmem:[%s347_s1 + $0xe8] sm:$0xff] }
   0x2   :  { %v39_v1 = vld [vmem:[%s347_s1 + $0x78] sm:$0xff]  ;;  %157 = vmatprep.subr.mxu0 %v55_v0  ;;  %v38_v3 = vld [vmem:[%s347_s1 + $0x70] sm:$0xff]  ;;  %v37_v5 = vld [vmem:[%s347_s1 + $0x68] sm:$0xff] }
   0x3   :  { %158 = vmatpush3.msra.mxu0 %v39_v1  ;;  %v52_v6 = vld [vmem:[%s347_s1 + $0xe0] sm:$0xff]  ;;  %v51_v8 = vld [vmem:[%s347_s1 + $0xd8] sm:$0xff]  ;;  %v50_v10 = vld [vmem:[%s347_s1 + $0xd0] sm:$0xff] }
   0x4   :  { %159 = vmatprep.subr.mxu0 %v54_v2  ;;  %v36_v7 = vld [vmem:[%s347_s1 + $0x60] sm:$0xff]  ;;  %v35_v9 = vld [vmem:[%s347_s1 + $0x58] sm:$0xff]  ;;  %v34_v11 = vld [vmem:[%s347_s1 + $0x50] sm:$0xff] }
   0x5   :  { %160 = vmatpush3.msra.mxu0 %v38_v3  ;;  %v49_v12 = vld [vmem:[%s347_s1 + $0xc8] sm:$0xff] }
   0x6   :  { %161 = vmatprep.subr.mxu0 %v53_v4  ;;  %v23_v13 = vld [vmem:[%s346_s0 + $0x8] sm:$0xff] }
   0x7   :  { %162 = vmatpush3.msra.mxu0 %v37_v5  ;;  %v33_v14 = vld [vmem:[%s347_s1 + $0x48] sm:$0xff]  ;;  %120 = vmatprep.mubr.f32.mxu0 %v23_v13 }
   0x8   :  { %163 = vmatprep.subr.mxu0 %v52_v6 }
   0x9   :  { %164 = vmatpush3.msra.mxu0 %v36_v7 }
   0xa   :  { %165 = vmatprep.subr.mxu0 %v51_v8 }
   0xb   :  { %166 = vmatpush3.msra.mxu0 %v35_v9 }
   0xc   :  { %167 = vmatprep.subr.mxu0 %v50_v10 }
   0xd   :  { %8 = vsyncpa [#allocation4], 0  ;;  %168 = vmatpush3.msra.mxu0 %v34_v11  ;;  %v48_v15 = vld [vmem:[%s347_s1 + $0xc0] sm:$0xff]  ;;  %v47_v17 = vld [vmem:[%s347_s1 + $0xb8] sm:$0xff]  ;;  %vm19_vm0 = vcmask 130048   ;;  %v216_v34 = vmov 0.0  }
   0xe   :  { %169 = vmatprep.subr.mxu0 %v49_v12  ;;  %v32_v16 = vld [vmem:[%s347_s1 + $0x40] sm:$0xff]  ;;  %v31_v18 = vld [vmem:[%s347_s1 + $0x38] sm:$0xff]  ;;  %v46_v19 = vld [vmem:[%s347_s1 + $0xb0] sm:$0xff]  ;;  %20 = vst.msk [vmem:[#allocation2] sm:$0xff] %vm19_vm0, %v216_v34 }
   0xf   :  { %170 = vmatpush3.msra.mxu0 %v33_v14  ;;  %v30_v20 = vld [vmem:[%s347_s1 + $0x30] sm:$0xff]  ;;  %v45_v21 = vld [vmem:[%s347_s1 + $0xa8] sm:$0xff]  ;;  %v44_v23 = vld [vmem:[%s347_s1 + $0xa0] sm:$0xff] }
  0x10   :  { %171 = vmatprep.subr.mxu0 %v48_v15  ;;  %v29_v22 = vld [vmem:[%s347_s1 + $0x28] sm:$0xff]  ;;  %v28_v24 = vld [vmem:[%s347_s1 + $0x20] sm:$0xff]  ;;  %v43_v25 = vld [vmem:[%s347_s1 + $0x98] sm:$0xff] }
  0x11   :  { %172 = vmatpush3.msra.mxu0 %v32_v16  ;;  %v27_v26 = vld [vmem:[%s347_s1 + $0x18] sm:$0xff]  ;;  %v42_v27 = vld [vmem:[%s347_s1 + $0x90] sm:$0xff]  ;;  %v41_v29 = vld [vmem:[%s347_s1 + $0x88] sm:$0xff] }
  0x12   :  { %173 = vmatprep.subr.mxu0 %v47_v17  ;;  %v26_v28 = vld [vmem:[%s347_s1 + $0x10] sm:$0xff]  ;;  %v25_v30 = vld [vmem:[%s347_s1 + $0x8] sm:$0xff]  ;;  %v40_v31 = vld [vmem:[%s347_s1 + $0x80] sm:$0xff] }
  0x13   :  { %174 = vmatpush3.msra.mxu0 %v31_v18  ;;  %v24_v32 = vld [vmem:[%s347_s1] sm:$0xff]  ;;  %s217_s1 = smov [#allocation3]  }
  0x14   :  { %175 = vmatprep.subr.mxu0 %v46_v19  ;;  %v22_v33 = vld [vmem:[%s346_s0] sm:$0xff]  ;;  %s148_s28 = sshll.u32 %s217_s1, 4  ;;  %s149_s28 = int_to_ptr.vmem [resolvable:$true] %s148_s28 }
  0x15   :  { %176 = vmatpush3.msra.mxu0 %v30_v20  ;;  %v21_v36 = vld [vmem:[#allocation2] sm:$0xff]  ;;  %s194_s0 = scalar_lea.vmem %s149_s28, 128  ;;  %p199_p1 = scmp.lt.s32.totalorder %s149_s28, %s149_s28 }
  0x16   :  { %177 = vmatprep.subr.mxu0 %v45_v21  ;;  %v156_v40 = vld [vmem:[%s348_s2] ss:$0 sm:$0xff]  ;;  %p195_p0 = scmp.ne.s32.totalorder %s149_s28, %s194_s0  ;;  %p200_p2 = scmp.lt.s32.totalorder %s194_s0, %s194_s0 }
  0x17   :  { %178 = vmatpush3.msra.mxu0 %v29_v22 }
  0x18   :  { %179 = vmatprep.subr.mxu0 %v44_v23  ;;  %p201_p3 = por %p200_p2, %p199_p1 }
  0x19   :  { %180 = vmatpush3.msra.mxu0 %v28_v24 }
  0x1a   :  { %181 = vmatprep.subr.mxu0 %v43_v25  ;;  %p202_p4 = pnand %p201_p3, %p195_p0 }
  0x1b   :  { %182 = vmatpush3.msra.mxu0 %v27_v26 }
  0x1c   :  { %183 = vmatprep.subr.mxu0 %v42_v27 }
  0x1d   :  { %184 = vmatpush3.msra.mxu0 %v26_v28 }
  0x1e   :  { %185 = vmatprep.subr.mxu0 %v41_v29 }
  0x1f   :  { %186 = vmatpush3.msra.mxu0 %v25_v30 }
  0x20   :  { %187 = vmatprep.subr.mxu0 %v40_v31 }
  0x21   :  { %188 = vmatpush3.msra.mxu0 %v24_v32 }
  0x22   :  { %121 = vmatmul.mubr.f32.vlgmr.msra.gmra.mxu0 %v22_v33 }
  0xe2   :  { %v189_v35 = vpop.f32.mrf.mxu0 }
  0xe4   :  { %v190_v37 = vpop.f32.mrf.mxu0 }
  0xe5   :  { %v191_v38 = vadd.f32 %v190_v37, %v189_v35 }
  0xe7   :  { %v126_v39 = vadd.f32 %v191_v38, %v21_v36 }
  0xe9   :  { %128 = vst.msk [vmem:[#allocation2] sm:$0xff] %vm19_vm0, %v126_v39 }
  0xf0   :  { %v132_v41 = vld [vmem:[#allocation2] sm:$0xff] }
  0xf1   :  { %v140_v42 = vadd.f32 %v156_v40, %v132_v41 }
  0xf3   :  { %141 = vst.msk [vmem:[#allocation3] sm:$0xff] %vm19_vm0, %v140_v42 }
  0xf4   :  { %205 = shalt.err (!%p202_p4)
}
  0xf5   :  { %151 = dma.vmem_to_hbm [thread:$0]  %s149_s28, 128, %s349_s3, [#allocation4]  }
  0xf6   :  { %214 = dma.done.wait [#allocation4], 128  }
  0xf7   :  { %215 = vsyncadd [#allocation4], 4294967168 }
  0xf8   :  { %155 = vsyncpa [#allocation4], 1 }

</bundles_post_ra>
